<compile_context>
chip_gen: v7x
topology: tpu7x:2x2x1
jax: 0.10.0
libtpu: 0.0.40
codegen_flags: <defaults>
</compile_context>

<pallas_src>
import jax
import jax.numpy as jnp
from jax.experimental import pallas as pl
from jax.experimental.pallas import tpu as pltpu

FP8_E4M3_MAX = 448.0            # max finite value of float8_e4m3fn
_TINY = 32 * 1024               # below this, whole-array single block
_VMEM_DB_BUDGET = 28 * 1024 * 1024  # double-buffered in+out tile budget (v7x-safe)


def _quant_input_kernel(scale_ref, x_ref, o_ref):
    # scale_ref: (1, 1) f32 in SMEM  -- the scalar scale_inv
    # x_ref:     (tm, lanes) hp-dtype tile in VMEM
    # o_ref:     (tm, lanes) float8_e4m3fn tile in VMEM
    s = scale_ref[0, 0]
    x = x_ref[...]
    if x.dtype == jnp.bfloat16:
        # Native bf16 VALU math (keeps the kernel mem-bound on v7x; on v5e
        # Mosaic lowers bf16 arithmetic itself). Python-float clip bounds are
        # weakly typed -> no promotion; 448 is exactly representable in bf16.
        y = x * s.astype(jnp.bfloat16)
        y = jnp.clip(y, -FP8_E4M3_MAX, FP8_E4M3_MAX)
    else:
        y = x.astype(jnp.float32) * s
        y = jnp.clip(y, -FP8_E4M3_MAX, FP8_E4M3_MAX)
    # Saturating cast (e4m3fn has no inf); NaN passes through clip -> fp8 NaN,
    # matching HPU saturating-cast semantics.
    o_ref[...] = y.astype(o_ref.dtype)


def _round_up(a, b):
    return ((a + b - 1) // b) * b


def quant_input(x, scale_inv, lp_dtype=jnp.float8_e4m3fn, *, max_tile_rows=2048):
    """Quantize hp-dtype tensor `x` to fp8 using multiplicative scale_inv."""
    assert lp_dtype == jnp.float8_e4m3fn, "only e4m3 lp_dtype implemented"
    orig_shape = x.shape
    n = x.size
    in_bytes = jnp.dtype(x.dtype).itemsize

    scale = jnp.asarray(scale_inv, dtype=jnp.float32).reshape(1, 1)
    flat = x.reshape(-1)

    if n < _TINY:
        # Tiny inputs: one whole-array block, no padding, no slicing.
        lanes, m_logical, tm, grid0, pad = n, 1, 1, 1, 0
    else:
        # Lane-dense slab: widest lane count dividing n (biggest store-packing
        # lever); if nothing divides, pad only the sub-row tail.
        lanes = next((c for c in (1024, 512, 256, 128) if n % c == 0), 1024)
        m_logical = pl.cdiv(n, lanes)
        pad = m_logical * lanes - n
        # >= 2 grid steps (both v7x TCs get work), row tile a multiple of 32
        # (fp8 packs 32 sublanes/vreg, bf16 16 -> fully packed loads/stores),
        # clamped so the double-buffered footprint stays within VMEM budget.
        nsteps = max(2, pl.cdiv(m_logical, max_tile_rows))
        tm = _round_up(pl.cdiv(m_logical, nsteps), 32)
        tm_cap = max(32, (_VMEM_DB_BUDGET // (2 * lanes * (in_bytes + 1))) // 32 * 32)
        tm = max(32, min(tm, tm_cap))
        grid0 = pl.cdiv(m_logical, tm)   # ragged last block handled by Pallas

    if pad:
        # TODO(synk): quantize the <lanes-element tail with plain jnp instead
        # of a whole-array pad+slice (only hit when n % 128 != 0).
        flat = jnp.pad(flat, (0, pad))
    x2d = flat.reshape(m_logical, lanes)

    tile_bytes = tm * lanes * (in_bytes + 1)
    vmem_limit = min(48 * 1024 * 1024, max(32 * 1024 * 1024, 3 * tile_bytes))

    out2d = pl.pallas_call(
        _quant_input_kernel,
        out_shape=jax.ShapeDtypeStruct((m_logical, lanes), jnp.float8_e4m3fn),
        grid=(grid0,),
        in_specs=[
            pl.BlockSpec(memory_space=pltpu.SMEM),          # scale_inv scalar
            pl.BlockSpec((tm, lanes), lambda i: (i, 0)),    # x tile
        ],
        out_specs=pl.BlockSpec((tm, lanes), lambda i: (i, 0)),
        compiler_params=pltpu.CompilerParams(
            dimension_semantics=("parallel",),
            vmem_limit_bytes=vmem_limit,
        ),
        cost_estimate=pl.CostEstimate(
            flops=2 * m_logical * lanes,                    # mul + clamp
            transcendentals=0,
            bytes_accessed=m_logical * lanes * (in_bytes + 1),
        ),
    )(scale, x2d)

    out_flat = out2d.reshape(-1)
    if pad:
        out_flat = out_flat[:n]
    return out_flat.reshape(orig_shape)


def quant_input_ref(x, scale_inv):
    """Pure-JAX reference mirroring the kernel's math exactly."""
    if x.dtype == jnp.bfloat16:
        s = jnp.asarray(scale_inv, dtype=jnp.float32).astype(jnp.bfloat16)
        y = x * s
    else:
        y = x.astype(jnp.float32) * jnp.float32(scale_inv)
    y = jnp.clip(y, -FP8_E4M3_MAX, FP8_E4M3_MAX)
    return y.astype(jnp.float8_e4m3fn)


def _check(x, scale_inv):
    out = jax.block_until_ready(quant_input(x, scale_inv))
    ref = quant_input_ref(x, scale_inv)
    assert out.shape == x.shape
    assert out.dtype == jnp.float8_e4m3fn
    assert jnp.array_equal(
        out.astype(jnp.float32), ref.astype(jnp.float32), equal_nan=True
    )


if __name__ == "__main__":
    key = jax.random.PRNGKey(0)
    scale_inv = 0.25  # ScaleFormat.CONST -> scalar tensor

    # 1) Small NCHW conv-style activation (tiny whole-array path, no padding).
    x = jax.random.normal(key, (2, 4, 16, 16), dtype=jnp.bfloat16) * 10.0
    _check(x, scale_inv)

    # 2) Medium aligned input: 1024-lane slab, 2-step parallel grid, no padding.
    x2 = jax.random.normal(key, (8, 64, 32, 32), dtype=jnp.bfloat16) * 5.0
    _check(x2, scale_inv)

    # 3) Aligned input with a ragged last row-tile (33*1024 elements, masked writeback).
    x3 = jax.random.normal(key, (33, 32, 32), dtype=jnp.bfloat16) * 2.0
    _check(x3, scale_inv)

    # 4) Non-128-divisible larger shape exercising the tail-pad path.
    x4 = jax.random.normal(key, (4, 3, 33, 95), dtype=jnp.bfloat16) * 3.0
    _check(x4, scale_inv)

    # 5) Tiny odd shape (whole-array block, no padding or slicing).
    x5 = jax.random.normal(key, (3, 5, 7, 11), dtype=jnp.bfloat16) * 3.0
    _check(x5, scale_inv)

    # 6) float32 input (f32 VALU path in the kernel).
    x6 = jax.random.normal(key, (2, 4, 16, 16), dtype=jnp.float32) * 10.0
    _check(x6, scale_inv)

    # 7) Saturation / special-value semantics (overflow, +-inf, NaN).
    x7 = jnp.array(
        [[1e4, -1e4, jnp.inf, -jnp.inf], [jnp.nan, 448.0, -500.0, 0.0]],
        dtype=jnp.bfloat16,
    )
    _check(x7, 1.0)

    print("KERNEL_OK")
</pallas_src>

<mosaic_0001>
module attributes {stable_mosaic.version = 11 : i64} {
  func.func @_quant_input_kernel(%arg0: i32, %arg1: memref<1x1xf32, #tpu.memory_space<smem>>, %arg2: memref<1x2048xbf16, #tpu.memory_space<vmem>>, %arg3: memref<1x2048xf8E4M3FN, #tpu.memory_space<vmem>>) attributes {dimension_semantics = [#tpu.dimension_semantics<parallel>], iteration_bounds = array<i64: 1>, scalar_prefetch = 0 : i64, scratch_operands = 0 : i64, tpu.core_type = #tpu.core_type<tc>, window_params = [{transform_indices = @transform_0, window_bounds = array<i64: 1, 1>}, {transform_indices = @transform_1, window_bounds = array<i64: 1, 2048>}, {transform_indices = @transform_2, window_bounds = array<i64: 1, 2048>}]} {
    %c0 = arith.constant 0 : index
    %c0_0 = arith.constant 0 : index
    %0 = memref.load %arg1[%c0, %c0_0] : memref<1x1xf32, #tpu.memory_space<smem>>
    %c0_1 = arith.constant 0 : index
    %c0_2 = arith.constant 0 : index
    %1 = vector.load %arg2[%c0_1, %c0_2] : memref<1x2048xbf16, #tpu.memory_space<vmem>>, vector<1x2048xbf16>
    %2 = arith.truncf %0 : f32 to bf16
    %3 = vector.broadcast %2 : bf16 to vector<1x2048xbf16>
    %4 = arith.mulf %1, %3 : vector<1x2048xbf16>
    %cst = arith.constant -4.480000e+02 : f32
    %cst_3 = arith.constant 4.480000e+02 : f32
    %5 = arith.truncf %cst : f32 to bf16
    %6 = vector.broadcast %5 : bf16 to vector<1x2048xbf16>
    %7 = arith.maximumf %6, %4 : vector<1x2048xbf16>
    %8 = arith.truncf %cst_3 : f32 to bf16
    %9 = vector.broadcast %8 : bf16 to vector<1x2048xbf16>
    %10 = arith.minimumf %9, %7 : vector<1x2048xbf16>
    %11 = arith.truncf %10 : vector<1x2048xbf16> to vector<1x2048xf8E4M3FN>
    %c0_4 = arith.constant 0 : index
    %c0_5 = arith.constant 0 : index
    %12 = vector.load %arg3[%c0_4, %c0_5] : memref<1x2048xf8E4M3FN, #tpu.memory_space<vmem>>, vector<1x2048xf8E4M3FN>
    tpu.vector_store %arg3[%c0_4, %c0_5], %11 {strides = array<i32>} : memref<1x2048xf8E4M3FN, #tpu.memory_space<vmem>>, vector<1x2048xf8E4M3FN>,
    return
  }
  func.func @transform_0(%arg0: i32) -> (i32, i32) {
    %c0_i32 = arith.constant 0 : i32
    %c0_i32_0 = arith.constant 0 : i32
    %c0_i32_1 = arith.constant 0 : i32
    return %c0_i32, %c0_i32_0 : i32, i32
  }
  func.func @transform_1(%arg0: i32) -> (i32, i32) {
    %c0_i32 = arith.constant 0 : i32
    %c0_i32_0 = arith.constant 0 : i32
    return %arg0, %c0_i32 : i32, i32
  }
  func.func @transform_2(%arg0: i32) -> (i32, i32) {
    %c0_i32 = arith.constant 0 : i32
    %c0_i32_0 = arith.constant 0 : i32
    return %arg0, %c0_i32 : i32, i32
  }
}

</mosaic_0001>

<bundles_post_ra>
// kernel: tpu_custom_call.1
= control target key start
LH: loop header
LB: loop body
LE: loop exit
PB: predicated region body
PF: predicated region fallthrough
CT: control target
= control target key end

     0   :  { %8 = vsyncpa [#allocation4], 0  ;;  %s551_s0 = inlined_call_operand.<no memory space> [shape: f32[1,1], index: 0, kind: input, shape index: {}]   ;;  %s552_s1 = inlined_call_operand.hbm [shape: bf16[1,2048], index: 1, kind: input, shape index: {}]   ;;  %s553_s2 = inlined_call_operand.hbm [shape: f8e4m3fn[1,2048], index: 2, kind: output, shape index: {}]  }
   0x1   :  { %9 = vsyncpa [#allocation5], 0  ;;  %s411_s9 = smov [#allocation3]   ;;  %s363_s13 = scalar_lea.hbm %s552_s1, 256 }
   0x2   :  { %s18_s10 = sshll.u32 %s411_s9, 4  ;;  %p364_p0 = scmp.ne.s32.totalorder %s552_s1, %s363_s13  ;;  %s19_s10 = int_to_ptr.vmem [resolvable:$true] %s18_s10 }
   0x3   :  { %p367_p1 = scmp.lt.u32.totalorder %s363_s13, %s552_s1 }
   0x5   :  { %p369_p2 = pnand %p367_p1, %p364_p0 }
   0x7   :  { %372 = shalt.err (!%p369_p2)
}
   0x8   :  { %s373_s18 = scalar_lea.vmem %s19_s10, 256  ;;  %p378_p4 = scmp.lt.s32.totalorder %s19_s10, %s19_s10 }
   0x9   :  { %p374_p3 = scmp.ne.s32.totalorder %s19_s10, %s373_s18  ;;  %p379_p5 = scmp.lt.s32.totalorder %s373_s18, %s373_s18 }
   0xb   :  { %p380_p6 = por %p379_p5, %p378_p4 }
   0xd   :  { %p381_p7 = pnand %p380_p6, %p374_p3 }
   0xf   :  { %384 = shalt.err (!%p381_p7)
}
  0x10   :  { %21 = dma.hbm_to_vmem [thread:$0]  %s552_s1, 256, %s19_s10, [#allocation4]  }
  0x11   :  { %407 = dma.done.wait [#allocation4], 256  }
  0x12   :  { %408 = vsyncadd [#allocation4], 4294967040  ;;  %s32_s23 = sshrl.u32 %s551_s0, 16  ;;  %p31_p8 = scmp.ne.f32.partialorder %s551_s0, %s551_s0  ;;  %vm298_vm0 = vcmask 1040384   ;;  %vm299_vm1 = vsmask.f32 0  ;;  %v56_v2 = vlaneseq }
  0x13   :  { %s33_s26 = sand.u32 1, %s32_s23  ;;  %vm301_vm2 = vcmask 1041409   ;;  %vm302_vm3 = vsmask.f32 1024  ;;  %v412_v0 = vmov 1966171168   ;;  %vm451_vm4 = vmand %vm298_vm0, %vm299_vm1 }
  0x14   :  { %s34_s27 = sadd.s32 32767, %s33_s26  ;;  %v54_v1 = vunpack.c.l.s4 %v412_v0  ;;  %vm455_vm5 = vmand %vm301_vm2, %vm302_vm3  ;;  %vm305_vm6 = vcmask 1042434   ;;  %vm306_vm7 = vsmask.f32 2048  ;;  %v57_v6 = vshrl.u32 %v56_v2, 7  ;;  %v28_v7 = vld [vmem:[#allocation3] sm:$0xff] }
  0x15   :  { %s35_s1 = sadd.s32 %s34_s27, %s551_s0  ;;  %vm304_vm8 = vmor %vm455_vm5, %vm451_vm4  ;;  %v29_v8 = vld [vmem:[#allocation3 + $0x8] sm:$0xff]  ;;  %vm309_vm10 = vcmask 1043459   ;;  %vm310_vm11 = vsmask.f32 3072  ;;  %vm313_vm14 = vcmask 1044484   ;;  %vm317_vm1 = vcmask 1045509  }
  0x16   :  { %s36_s30 = sand.u32 4294901760, %s35_s1  ;;  %v55_v5 = vunpack.c.0.s8 %v54_v1  ;;  %vm307_vm9 = vmand %vm305_vm6, %vm306_vm7  ;;  %vm314_vm15 = vsmask.f32 4096  ;;  %vm318_vm2 = vsmask.f32 5120  ;;  %vm321_vm4 = vcmask 1046534  }
  0x17   :  { %s571_s30 = smov (%p31_p8, %s36_s30), 2143289344  ;;  %vm465_vm12 = vmor %vm307_vm9, %vm304_vm8  ;;  %vm322_vm5 = vsmask.f32 6144  ;;  %s413_s5 = smov [#allocation6]  }
  0x18   :  { %s39_s3 = sshrl.u32 %s571_s30, 16  ;;  %v463_v11 = vsub.s32 %v55_v5, %v57_v6  ;;  %vm469_vm13 = vmand %vm309_vm10, %vm310_vm11  ;;  %vm325_vm10 = vcmask 1047559   ;;  %vm326_vm11 = vsmask.f32 7168  ;;  %v329_v6 = vld [vmem:[#allocation6] sm:$0xff]  ;;  %s341_s6 = sshll.u32 %s413_s5, 4  ;;  %s342_s6 = int_to_ptr.vmem [resolvable:$true] %s341_s6 }
  0x19   :  { %s40_s0 = sshll.u32 %s39_s3, 16  ;;  %vm312_vm0 = vmor %vm469_vm13, %vm465_vm12  ;;  %s385_s7 = scalar_lea.vmem %s342_s6, 256 }
  0x1a   :  { %s41_s4 = sor.u32 %s40_s0, %s39_s3  ;;  %vm315_vm3 = vmand %vm313_vm14, %vm314_vm15  ;;  %p386_p9 = scmp.ne.s32.totalorder %s342_s6, %s385_s7 }
  0x1b   :  { %v42_v9 = vstv %s41_s4  ;;  %vm490_vm6 = vmor %vm315_vm3, %vm312_vm0  ;;  %p390_p10 = scmp.lt.s32.totalorder %s342_s6, %s342_s6  ;;  %p391_p11 = scmp.lt.s32.totalorder %s385_s7, %s385_s7 }
  0x1c   :  { %v44_v10 = vmul.bf16 %v42_v9, %v28_v7  ;;  %v45_v12 = vmul.bf16 %v42_v9, %v29_v8  ;;  %vm499_vm7 = vmand %vm317_vm1, %vm318_vm2  ;;  %v332_v9 = vld [vmem:[#allocation6 + $0x8] sm:$0xff] }
  0x1d   :  { %vm320_vm8 = vmor %vm499_vm7, %vm490_vm6  ;;  %p392_p12 = por %p391_p11, %p390_p10 }
  0x1e   :  { %v350_v14 = vclamps-bf16 %v44_v10, 448, 448  ;;  %v351_v16 = vclamps-bf16 %v45_v12, 448, 448  ;;  %vm323_vm9 = vmand %vm321_vm4, %vm322_vm5 }
  0x1f   :  { %vm522_vm12 = vmor %vm323_vm9, %vm320_vm8  ;;  %p393_p13 = pnand %p392_p12, %p386_p9 }
  0x20   :  { %v52_v17 = vcombine.high %v350_v14, %v350_v14  ;;  %v59_v18 = vrot.slane %v350_v14, %v463_v11  ;;  %v101_v19 = vcombine.high %v351_v16, %v351_v16  ;;  %v108_v20 = vrot.slane %v351_v16, %v463_v11  ;;  %vm528_vm13 = vmand %vm325_vm10, %vm326_vm11 }
  0x21   :  { %vm328_vm14 = vmor %vm528_vm13, %vm522_vm12 }
  0x22   :  { %v66_v21 = vrot.slane %v52_v17, %v463_v11  ;;  %v67_v22 = vcombine.high %v59_v18, %v59_v18  ;;  %v75_v23 = vrot.slane %v59_v18, %v463_v11  ;;  %v115_v24 = vrot.slane %v101_v19, %v463_v11 }
  0x23   :  { %v116_v25 = vcombine.high %v108_v20, %v108_v20  ;;  %v124_v26 = vrot.slane %v108_v20, %v463_v11 }
  0x24   :  { %v68_v27 = vcombine.high %v66_v21, %v66_v21  ;;  %v82_v28 = vrot.slane %v66_v21, %v463_v11  ;;  %v89_v29 = vrot.slane %v67_v22, %v463_v11  ;;  %v97_v30 = vcombine.high %v75_v23, %v75_v23 }
  0x25   :  { %v117_v32 = vcombine.high %v115_v24, %v115_v24  ;;  %v131_v33 = vrot.slane %v115_v24, %v463_v11  ;;  %v138_v34 = vrot.slane %v116_v25, %v463_v11  ;;  %v146_v35 = vcombine.high %v124_v26, %v124_v26 }
  0x26   :  { %v96_v36 = vrot.slane %v68_v27, %v463_v11  ;;  %v98_v37 = vcombine.high %v82_v28, %v82_v28  ;;  %v99_v38 = vcombine.high %v89_v29, %v89_v29  ;;  %v352_v39 = vpack.c.e4m3fn %v89_v29, %v75_v23 }
  0x27   :  { %v145_v41 = vrot.slane %v117_v32, %v463_v11  ;;  %v147_v42 = vcombine.high %v131_v33, %v131_v33  ;;  %v148_v43 = vcombine.high %v138_v34, %v138_v34  ;;  %v356_v44 = vpack.c.e4m3fn %v138_v34, %v124_v26 }
  0x28   :  { %v100_v45 = vcombine.high %v96_v36, %v96_v36  ;;  %v353_v46 = vpack.c.e4m3fn %v99_v38, %v97_v30  ;;  %v354_v47 = vpack.c.e4m3fn %v96_v36, %v82_v28  ;;  %v208_v48 = vrot.slane %v352_v39, %v463_v11 }
  0x29   :  { %v149_v49 = vcombine.high %v145_v41, %v145_v41  ;;  %v357_v50 = vpack.c.e4m3fn %v148_v43, %v146_v35  ;;  %v358_v51 = vpack.c.e4m3fn %v145_v41, %v131_v33  ;;  %v257_v52 = vrot.slane %v356_v44, %v463_v11 }
  0x2a   :  { %v355_v53 = vpack.c.e4m3fn %v100_v45, %v98_v37  ;;  %v215_v54 = vrot.slane %v353_v46, %v463_v11  ;;  %v222_v55 = vrot.slane %v354_v47, %v463_v11 }
  0x2b   :  { %v359_v56 = vpack.c.e4m3fn %v149_v49, %v147_v42  ;;  %v264_v57 = vrot.slane %v357_v50, %v463_v11  ;;  %v271_v58 = vrot.slane %v358_v51, %v463_v11 }
  0x2c   :  { %v229_v59 = vrot.slane %v355_v53, %v463_v11  ;;  %v230_v60 = vcombine.low %v208_v48, %v215_v54 }
  0x2d   :  { %v278_v62 = vrot.slane %v359_v56, %v463_v11  ;;  %v279_v63 = vcombine.low %v257_v52, %v264_v57 }
  0x2e   :  { %v231_v0 = vcombine.low %v222_v55, %v229_v59  ;;  %v238_v1 = vrot.slane %v230_v60, %v463_v11 }
  0x2f   :  { %v280_v3 = vcombine.low %v271_v58, %v278_v62  ;;  %v287_v4 = vrot.slane %v279_v63, %v463_v11 }
  0x30   :  { %v245_v5 = vrot.slane %v231_v0, %v463_v11 }
  0x31   :  { %v294_v7 = vrot.slane %v280_v3, %v463_v11 }
  0x32   :  { %v246_v8 = vcombine.low %v238_v1, %v245_v5 }
  0x33   :  { %v295_v10 = vcombine.low %v287_v4, %v294_v7 }
  0x34   :  { %v330_v12 = vsel %vm328_vm14, %v246_v8, %v329_v6 }
  0x35   :  { %331 = vst [vmem:[#allocation6] sm:$0xff] %v330_v12  ;;  %v333_v13 = vsel %vm328_vm14, %v295_v10, %v332_v9 }
  0x36   :  { %334 = vst [vmem:[#allocation6 + $0x8] sm:$0xff] %v333_v13 }
  0x37   :  { %396 = shalt.err (!%p393_p13)
}
  0x38   :  { %s397_s10 = scalar_lea.hbm %s553_s2, 256 }
  0x39   :  { %p398_p0 = scmp.ne.s32.totalorder %s553_s2, %s397_s10  ;;  %p401_p1 = scmp.lt.u32.totalorder %s397_s10, %s553_s2 }
  0x3b   :  { %p403_p2 = pnand %p401_p1, %p398_p0 }
  0x3d   :  { %406 = shalt.err (!%p403_p2)
}
  0x3e   :  { %344 = dma.vmem_to_hbm [thread:$0]  %s342_s6, 256, %s553_s2, [#allocation5]  }
  0x3f   :  { %409 = dma.done.wait [#allocation5], 256  }
  0x40   :  { %410 = vsyncadd [#allocation5], 4294967040 }
  0x41   :  { %348 = vsyncpa [#allocation4], 1 }
  0x42   :  { %349 = vsyncpa [#allocation5], 1 }

</bundles_post_ra>
